<compile_context>
chip_gen: v7x
topology: tpu7x:2x2x1
jax: 0.10.0
libtpu: 0.0.40
codegen_flags: <defaults>
</compile_context>

<pallas_src>
import functools
import math

import jax
import jax.numpy as jnp
from jax.experimental import pallas as pl
from jax.experimental.pallas import tpu as pltpu

_SLOT = 128  # lane-aligned slot width per layer inside the packed (1, L*_SLOT) slabs


def _mvg_fused_kernel(x_ref, *rest, dims):
    """Fused forward over all variational layers.

    rest = (w_cat_0, ..., w_cat_{L-1}, su_slab_ref, b_slab_ref, o_ref)
      w_cat_l : (2*din_l, dout_l)  = concat([M_w, eps_w * exp(0.5 v)], axis=0)
      su_slab : (1, L*_SLOT)       layer l's exp(0.5*u_w) in lanes [l*_SLOT, l*_SLOT+din_l)
      b_slab  : (1, L*_SLOT)       layer l's fused bias   in lanes [l*_SLOT, l*_SLOT+dout_l)
    """
    n_layers = len(dims)
    w_refs = rest[:n_layers]
    su_ref = rest[n_layers]
    b_ref = rest[n_layers + 1]
    o_ref = rest[n_layers + 2]

    x = x_ref[...]  # (bt, d_in) f32
    for l, (din, dout) in enumerate(dims):
        if l > 0:
            x = jnp.maximum(x, 0.0)                       # ReLU between layers only
        su = su_ref[:, l * _SLOT: l * _SLOT + din]        # (1, din)  precomputed exp(0.5*u_w)
        b = b_ref[:, l * _SLOT: l * _SLOT + dout]         # (1, dout) precombined bias
        xa = jnp.concatenate([x, x * su], axis=-1)        # (bt, 2*din)
        x = jnp.dot(xa, w_refs[l][...], preferred_element_type=jnp.float32) + b
    o_ref[...] = x.astype(o_ref.dtype)


def mvg_forward(x, params, key, *, batch_tile=None):
    """MVG.forward: 4 variational layers, ReLU between, one fused Pallas kernel.

    params: list of (m, u, v) with m: (din+1, dout) (last row = bias), u: (din+1,), v: (dout,).
    """
    B, d_in = x.shape
    n_layers = len(params)
    d_out = params[-1][0].shape[1]

    bt = B if batch_tile is None else batch_tile
    assert B % bt == 0 and (bt % 8 == 0 or bt == B)

    keys = jax.random.split(key, n_layers)
    dims = []
    w_cats = []
    su_cols = []
    b_cols = []
    for (m, u, v), keps in zip(params, keys):
        K, N = m.shape
        din = K - 1
        dims.append((din, N))
        eps = jax.random.normal(keps, (K, N), dtype=jnp.float32)   # weight_epsilons ~ N(0,1)

        sv = jnp.exp(0.5 * v).reshape(1, N)                        # hoisted col scale
        su = jnp.exp(0.5 * u[:din]).reshape(1, din)                # hoisted row scale (lane-dense)
        w_cat = jnp.concatenate([m[:din], eps[:din] * sv], axis=0)  # (2*din, N)
        b = m[din:] + jnp.exp(0.5 * u[din]) * eps[din:] * sv        # (1, N) fused bias

        w_cats.append(w_cat)
        su_cols.append(jnp.pad(su, ((0, 0), (0, _SLOT - din))))    # pad each to a 128-lane slot
        b_cols.append(jnp.pad(b, ((0, 0), (0, _SLOT - N))))

    su_slab = jnp.concatenate(su_cols, axis=-1)   # (1, n_layers*_SLOT)
    b_slab = jnp.concatenate(b_cols, axis=-1)     # (1, n_layers*_SLOT)

    in_specs = [pl.BlockSpec((bt, d_in), lambda i: (i, 0))]        # x: tiled over batch
    for w in w_cats:
        # Full-array VMEM residency (tiny params); constant block index across grid steps.
        in_specs.append(pl.BlockSpec(w.shape, lambda i: (0, 0)))
    in_specs.append(pl.BlockSpec(su_slab.shape, lambda i: (0, 0)))
    in_specs.append(pl.BlockSpec(b_slab.shape, lambda i: (0, 0)))

    kernel = functools.partial(_mvg_fused_kernel, dims=tuple(dims))

    return pl.pallas_call(
        kernel,
        out_shape=jax.ShapeDtypeStruct((B, d_out), jnp.float32),
        grid=(B // bt,),
        in_specs=in_specs,
        out_specs=pl.BlockSpec((bt, d_out), lambda i: (i, 0)),
        compiler_params=pltpu.CompilerParams(
            # Only shards across v7x's 2 TCs when B//bt >= 2 (pass batch_tile for that).
            dimension_semantics=("parallel",),
            # Explicit cap keeps the full-array-resident specs portable to v7x's 64 MiB VMEM.
            vmem_limit_bytes=32 * 1024 * 1024,
        ),
    )(x, *w_cats, su_slab, b_slab)


def init_mvg_params(key, input_size, hidden_size, output_size):
    """Deterministic re-implementation of MVGLayer.reset_posterior for the 4 layers."""
    layer_dims = [
        (input_size, hidden_size),
        (hidden_size, hidden_size),
        (hidden_size, hidden_size),
        (hidden_size, output_size),
    ]
    params = []
    for (din, dout) in layer_dims:
        key, km = jax.random.split(key)
        k = din + 1  # +1 for the bias row (appended ones column in the torch code)
        m = 0.001 * jax.random.normal(km, (k, dout), dtype=jnp.float32)   # N(0, 0.001)
        u = jnp.full((k,), math.log(0.001), dtype=jnp.float32)            # posterior_W_u
        v = jnp.full((dout,), math.log(0.001), dtype=jnp.float32)         # posterior_W_v
        params.append((m, u, v))
    return params


def mvg_forward_reference(x, params, key):
    """Pure-JAX reference of the original formulation (same eps sampling order)."""
    keys = jax.random.split(key, len(params))
    first = True
    for (m, u, v), keps in zip(params, keys):
        eps = jax.random.normal(keps, m.shape, dtype=jnp.float32)
        if not first:
            x = jnp.maximum(x, 0.0)
        x_aug = jnp.concatenate([x, jnp.ones((x.shape[0], 1), dtype=x.dtype)], axis=1)
        w = m + jnp.exp(0.5 * u)[:, None] * eps * jnp.exp(0.5 * v)[None, :]
        x = x_aug @ w
        first = False
    return x


if __name__ == "__main__":
    input_size, hidden_size, output_size = 16, 32, 8
    batch = 8

    root = jax.random.PRNGKey(0)
    k_params, k_data, k_eps = jax.random.split(root, 3)

    params = init_mvg_params(k_params, input_size, hidden_size, output_size)
    x = jax.random.normal(k_data, (batch, input_size), dtype=jnp.float32)

    fwd = jax.jit(mvg_forward)
    out = fwd(x, params, k_eps)
    out = jax.block_until_ready(out)

    ref = mvg_forward_reference(x, params, k_eps)
    assert out.shape == (batch, output_size)
    assert jnp.allclose(out, ref, atol=1e-5, rtol=1e-4), "Pallas output mismatch vs JAX reference"

    print("KERNEL_OK")
</pallas_src>

<mosaic_0001>
module attributes {stable_mosaic.version = 11 : i64} {
  func.func @_mvg_fused_kernel(%arg0: i32, %arg1: memref<8x16xf32, #tpu.memory_space<vmem>>, %arg2: memref<32x32xf32, #tpu.memory_space<vmem>>, %arg3: memref<64x32xf32, #tpu.memory_space<vmem>>, %arg4: memref<64x32xf32, #tpu.memory_space<vmem>>, %arg5: memref<64x8xf32, #tpu.memory_space<vmem>>, %arg6: memref<1x512xf32, #tpu.memory_space<vmem>>, %arg7: memref<1x512xf32, #tpu.memory_space<vmem>>, %arg8: memref<8x8xf32, #tpu.memory_space<vmem>>) attributes {dimension_semantics = [#tpu.dimension_semantics<parallel>], iteration_bounds = array<i64: 1>, scalar_prefetch = 0 : i64, scratch_operands = 0 : i64, tpu.core_type = #tpu.core_type<tc>, window_params = [{transform_indices = @transform_0, window_bounds = array<i64: 8, 16>}, {pipeline_mode = #tpu.pipeline_mode<synchronous>, transform_indices = @transform_1, window_bounds = array<i64: 32, 32>}, {pipeline_mode = #tpu.pipeline_mode<synchronous>, transform_indices = @transform_2, window_bounds = array<i64: 64, 32>}, {pipeline_mode = #tpu.pipeline_mode<synchronous>, transform_indices = @transform_3, window_bounds = array<i64: 64, 32>}, {pipeline_mode = #tpu.pipeline_mode<synchronous>, transform_indices = @transform_4, window_bounds = array<i64: 64, 8>}, {pipeline_mode = #tpu.pipeline_mode<synchronous>, transform_indices = @transform_5, window_bounds = array<i64: 1, 512>}, {pipeline_mode = #tpu.pipeline_mode<synchronous>, transform_indices = @transform_6, window_bounds = array<i64: 1, 512>}, {transform_indices = @transform_7, window_bounds = array<i64: 8, 8>}]} {
    %c0 = arith.constant 0 : index
    %c0_0 = arith.constant 0 : index
    %0 = vector.load %arg1[%c0, %c0_0] : memref<8x16xf32, #tpu.memory_space<vmem>>, vector<8x16xf32>
    %c0_1 = arith.constant 0 : index
    %c0_2 = arith.constant 0 : index
    %1 = vector.load %arg6[%c0_1, %c0_2] : memref<1x512xf32, #tpu.memory_space<vmem>>, vector<1x16xf32>
    %c0_3 = arith.constant 0 : index
    %c0_4 = arith.constant 0 : index
    %2 = vector.load %arg7[%c0_3, %c0_4] : memref<1x512xf32, #tpu.memory_space<vmem>>, vector<1x32xf32>
    %3 = vector.broadcast %1 : vector<1x16xf32> to vector<8x16xf32>
    %4 = arith.mulf %0, %3 : vector<8x16xf32>
    %5 = tpu.concatenate %0, %4 in 1 : vector<8x16xf32>, vector<8x16xf32> -> vector<8x32xf32>
    %c0_5 = arith.constant 0 : index
    %c0_6 = arith.constant 0 : index
    %6 = vector.load %arg2[%c0_5, %c0_6] : memref<32x32xf32, #tpu.memory_space<vmem>>, vector<32x32xf32>
    %cst = arith.constant dense<0.000000e+00> : vector<8x32xf32>
    %7 = tpu.matmul %5, %6, %cst {dimension_numbers = #tpu.dot_dimension_numbers<[1], [0], [0], [1], [0, 0, 1, 1], [], []>} : vector<8x32xf32>, vector<32x32xf32>, vector<8x32xf32> -> vector<8x32xf32>
    %8 = vector.broadcast %2 : vector<1x32xf32> to vector<8x32xf32>
    %9 = arith.addf %7, %8 : vector<8x32xf32>
    %cst_7 = arith.constant 0.000000e+00 : f32
    %10 = vector.broadcast %cst_7 : f32 to vector<8x32xf32>
    %11 = arith.maximumf %9, %10 : vector<8x32xf32>
    %c0_8 = arith.constant 0 : index
    %c128 = arith.constant 128 : index
    %12 = vector.load %arg6[%c0_8, %c128] : memref<1x512xf32, #tpu.memory_space<vmem>>, vector<1x32xf32>
    %c0_9 = arith.constant 0 : index
    %c128_10 = arith.constant 128 : index
    %13 = vector.load %arg7[%c0_9, %c128_10] : memref<1x512xf32, #tpu.memory_space<vmem>>, vector<1x32xf32>
    %14 = vector.broadcast %12 : vector<1x32xf32> to vector<8x32xf32>
    %15 = arith.mulf %11, %14 : vector<8x32xf32>
    %16 = tpu.concatenate %11, %15 in 1 : vector<8x32xf32>, vector<8x32xf32> -> vector<8x64xf32>
    %c0_11 = arith.constant 0 : index
    %c0_12 = arith.constant 0 : index
    %17 = vector.load %arg3[%c0_11, %c0_12] : memref<64x32xf32, #tpu.memory_space<vmem>>, vector<64x32xf32>
    %cst_13 = arith.constant dense<0.000000e+00> : vector<8x32xf32>
    %18 = tpu.matmul %16, %17, %cst_13 {dimension_numbers = #tpu.dot_dimension_numbers<[1], [0], [0], [1], [0, 0, 1, 1], [], []>} : vector<8x64xf32>, vector<64x32xf32>, vector<8x32xf32> -> vector<8x32xf32>
    %19 = vector.broadcast %13 : vector<1x32xf32> to vector<8x32xf32>
    %20 = arith.addf %18, %19 : vector<8x32xf32>
    %cst_14 = arith.constant 0.000000e+00 : f32
    %21 = vector.broadcast %cst_14 : f32 to vector<8x32xf32>
    %22 = arith.maximumf %20, %21 : vector<8x32xf32>
    %c0_15 = arith.constant 0 : index
    %c256 = arith.constant 256 : index
    %23 = vector.load %arg6[%c0_15, %c256] : memref<1x512xf32, #tpu.memory_space<vmem>>, vector<1x32xf32>
    %c0_16 = arith.constant 0 : index
    %c256_17 = arith.constant 256 : index
    %24 = vector.load %arg7[%c0_16, %c256_17] : memref<1x512xf32, #tpu.memory_space<vmem>>, vector<1x32xf32>
    %25 = vector.broadcast %23 : vector<1x32xf32> to vector<8x32xf32>
    %26 = arith.mulf %22, %25 : vector<8x32xf32>
    %27 = tpu.concatenate %22, %26 in 1 : vector<8x32xf32>, vector<8x32xf32> -> vector<8x64xf32>
    %c0_18 = arith.constant 0 : index
    %c0_19 = arith.constant 0 : index
    %28 = vector.load %arg4[%c0_18, %c0_19] : memref<64x32xf32, #tpu.memory_space<vmem>>, vector<64x32xf32>
    %cst_20 = arith.constant dense<0.000000e+00> : vector<8x32xf32>
    %29 = tpu.matmul %27, %28, %cst_20 {dimension_numbers = #tpu.dot_dimension_numbers<[1], [0], [0], [1], [0, 0, 1, 1], [], []>} : vector<8x64xf32>, vector<64x32xf32>, vector<8x32xf32> -> vector<8x32xf32>
    %30 = vector.broadcast %24 : vector<1x32xf32> to vector<8x32xf32>
    %31 = arith.addf %29, %30 : vector<8x32xf32>
    %cst_21 = arith.constant 0.000000e+00 : f32
    %32 = vector.broadcast %cst_21 : f32 to vector<8x32xf32>
    %33 = arith.maximumf %31, %32 : vector<8x32xf32>
    %c0_22 = arith.constant 0 : index
    %c384 = arith.constant 384 : index
    %34 = vector.load %arg6[%c0_22, %c384] : memref<1x512xf32, #tpu.memory_space<vmem>>, vector<1x32xf32>
    %c0_23 = arith.constant 0 : index
    %c384_24 = arith.constant 384 : index
    %35 = vector.load %arg7[%c0_23, %c384_24] : memref<1x512xf32, #tpu.memory_space<vmem>>, vector<1x8xf32>
    %36 = vector.broadcast %34 : vector<1x32xf32> to vector<8x32xf32>
    %37 = arith.mulf %33, %36 : vector<8x32xf32>
    %38 = tpu.concatenate %33, %37 in 1 : vector<8x32xf32>, vector<8x32xf32> -> vector<8x64xf32>
    %c0_25 = arith.constant 0 : index
    %c0_26 = arith.constant 0 : index
    %39 = vector.load %arg5[%c0_25, %c0_26] : memref<64x8xf32, #tpu.memory_space<vmem>>, vector<64x8xf32>
    %cst_27 = arith.constant dense<0.000000e+00> : vector<8x8xf32>
    %40 = tpu.matmul %38, %39, %cst_27 {dimension_numbers = #tpu.dot_dimension_numbers<[1], [0], [0], [1], [0, 0, 1, 1], [], []>} : vector<8x64xf32>, vector<64x8xf32>, vector<8x8xf32> -> vector<8x8xf32>
    %41 = vector.broadcast %35 : vector<1x8xf32> to vector<8x8xf32>
    %42 = arith.addf %40, %41 : vector<8x8xf32>
    %c0_28 = arith.constant 0 : index
    %c0_29 = arith.constant 0 : index
    %43 = vector.load %arg8[%c0_28, %c0_29] : memref<8x8xf32, #tpu.memory_space<vmem>>, vector<8x8xf32>
    tpu.vector_store %arg8[%c0_28, %c0_29], %42 {strides = array<i32>} : memref<8x8xf32, #tpu.memory_space<vmem>>, vector<8x8xf32>,
    return
  }
  func.func @transform_0(%arg0: i32) -> (i32, i32) {
    %c0_i32 = arith.constant 0 : i32
    %c0_i32_0 = arith.constant 0 : i32
    return %arg0, %c0_i32 : i32, i32
  }
  func.func @transform_1(%arg0: i32) -> (i32, i32) {
    %c0_i32 = arith.constant 0 : i32
    %c0_i32_0 = arith.constant 0 : i32
    %c0_i32_1 = arith.constant 0 : i32
    return %c0_i32, %c0_i32_0 : i32, i32
  }
  func.func @transform_2(%arg0: i32) -> (i32, i32) {
    %c0_i32 = arith.constant 0 : i32
    %c0_i32_0 = arith.constant 0 : i32
    %c0_i32_1 = arith.constant 0 : i32
    return %c0_i32, %c0_i32_0 : i32, i32
  }
  func.func @transform_3(%arg0: i32) -> (i32, i32) {
    %c0_i32 = arith.constant 0 : i32
    %c0_i32_0 = arith.constant 0 : i32
    %c0_i32_1 = arith.constant 0 : i32
    return %c0_i32, %c0_i32_0 : i32, i32
  }
  func.func @transform_4(%arg0: i32) -> (i32, i32) {
    %c0_i32 = arith.constant 0 : i32
    %c0_i32_0 = arith.constant 0 : i32
    %c0_i32_1 = arith.constant 0 : i32
    return %c0_i32, %c0_i32_0 : i32, i32
  }
  func.func @transform_5(%arg0: i32) -> (i32, i32) {
    %c0_i32 = arith.constant 0 : i32
    %c0_i32_0 = arith.constant 0 : i32
    %c0_i32_1 = arith.constant 0 : i32
    return %c0_i32, %c0_i32_0 : i32, i32
  }
  func.func @transform_6(%arg0: i32) -> (i32, i32) {
    %c0_i32 = arith.constant 0 : i32
    %c0_i32_0 = arith.constant 0 : i32
    %c0_i32_1 = arith.constant 0 : i32
    return %c0_i32, %c0_i32_0 : i32, i32
  }
  func.func @transform_7(%arg0: i32) -> (i32, i32) {
    %c0_i32 = arith.constant 0 : i32
    %c0_i32_0 = arith.constant 0 : i32
    return %arg0, %c0_i32 : i32, i32
  }
}

</mosaic_0001>

<bundles_post_ra>
// kernel: mvg_forward.3
= control target key start
LH: loop header
LB: loop body
LE: loop exit
PB: predicated region body
PF: predicated region fallthrough
CT: control target
= control target key end

     0   :  { %v634_v4 = vmov 0.0|0.0   ;;  %vm635_vm0 = vmmov 0   ;;  %v636_v9 = vmov 0.0   ;;  %s831_s0 = inlined_call_operand.vmem [shape: f32[8,16], index: 0, kind: input, shape index: {}]   ;;  %s832_s1 = inlined_call_operand.vmem [shape: f32[32,32], index: 1, kind: input, shape index: {}]   ;;  %s833_s2 = inlined_call_operand.vmem [shape: f32[64,32], index: 2, kind: input, shape index: {}]   ;;  %s834_s3 = inlined_call_operand.vmem [shape: f32[64,32], index: 3, kind: input, shape index: {}]   ;;  %s835_s4 = inlined_call_operand.vmem [shape: f32[64,8], index: 4, kind: input, shape index: {}]   ;;  %s836_s5 = inlined_call_operand.vmem [shape: f32[1,512], index: 5, kind: input, shape index: {}]   ;;  %s837_s6 = inlined_call_operand.vmem [shape: f32[1,512], index: 6, kind: input, shape index: {}]   ;;  %s838_s7 = inlined_call_operand.hbm [shape: f32[8,8], index: 7, kind: output, shape index: {}]  }
   0x1   :  { %v27_v0 = vld [vmem:[%s831_s0] sm:$0xff]  ;;  %562 = vmatprep.subr.bf16.mxu0 %v634_v4  ;;  %v44_v5 = vld [vmem:[%s832_s1 + $0x8] sm:$0xff]  ;;  %v45_v6 = vld [vmem:[%s832_s1 + $0x10] sm:$0xff]  ;;  %568 = vmatprep.subr.bf16.mxu1 %v634_v4 }
   0x2   :  { %v450_v1 = vld [vmem:[%s836_s5] ss:$0 sm:$0xff]  ;;  %v46_v7 = vld [vmem:[%s832_s1 + $0x18] sm:$0xff]  ;;  %502 = vmatprep.mubr.msk.f32.mxu0 %vm635_vm0, %v636_v9  ;;  %521 = vmatprep.mubr.msk.f32.mxu1 %vm635_vm0, %v636_v9 }
   0x3   :  { %v43_v2 = vld [vmem:[%s832_s1] sm:$0xff]  ;;  %v36_v3 = vmul.f32 %v450_v1, %v27_v0 }
   0x4   :  { %v563_v8 = vpack.c.bf16 %v44_v5, %v43_v2 }
   0x5   :  { %12 = vsyncpa [#allocation3], 0  ;;  %s637_s12 = smov 16   ;;  %v566_v10 = vpack.c.bf16 %v46_v7, %v45_v6  ;;  %vm41_vm1 = vcmask 130048   ;;  %vm53_vm2 = vcmask 261120   ;;  %v142_v13 = vld [vmem:[%s833_s2] sm:$0xff] }
   0x6   :  { %38 = vrot.lane.b32.xlu0 %v36_v3, %s637_s12  ;;  %564 = vmatpush3.bf16.msra.mxu0 %v563_v8  ;;  %v143_v14 = vld [vmem:[%s833_s2 + $0x8] sm:$0xff]  ;;  %v144_v15 = vld [vmem:[%s833_s2 + $0x10] sm:$0xff]  ;;  %v145_v17 = vld [vmem:[%s833_s2 + $0x18] sm:$0xff]  ;;  %vm156_vm3 = vcmask 523264   ;;  %s639_s22 = smov [#allocation2]   ;;  %vm434_vm4 = vcmask 64512  }
   0x7   :  { %565 = vmatprep.subr.bf16.mxu0 %v634_v4  ;;  %v569_v16 = vpack.c.bf16 %v143_v14, %v142_v13  ;;  %v572_v18 = vpack.c.bf16 %v145_v17, %v144_v15  ;;  %v146_v19 = vld [vmem:[%s833_s2 + $0x20] sm:$0xff]  ;;  %v147_v20 = vld [vmem:[%s833_s2 + $0x28] sm:$0xff]  ;;  %v148_v22 = vld [vmem:[%s833_s2 + $0x30] sm:$0xff]  ;;  %s442_s23 = sshll.u32 %s639_s22, 4  ;;  %s443_s23 = int_to_ptr.vmem [resolvable:$true] %s442_s23 }
   0x8   :  { %v575_v21 = vpack.c.bf16 %v147_v20, %v146_v19  ;;  %v149_v23 = vld [vmem:[%s833_s2 + $0x38] sm:$0xff]  ;;  %v451_v25 = vld [vmem:[%s837_s6] ss:$0 sm:$0xff]  ;;  %v453_v29 = vld [vmem:[%s836_s5 + $0x1] ss:$0 sm:$0xff]  ;;  %s638_s2 = smov 32   ;;  %p615_p1 = scmp.lt.s32.totalorder %s443_s23, %s443_s23 }
   0x9   :  { %570 = vmatpush3.bf16.msra.mxu1 %v569_v16  ;;  %v578_v24 = vpack.c.bf16 %v149_v23, %v148_v22  ;;  %v245_v34 = vld [vmem:[%s834_s3] sm:$0xff]  ;;  %v246_v35 = vld [vmem:[%s834_s3 + $0x8] sm:$0xff]  ;;  %v247_v36 = vld [vmem:[%s834_s3 + $0x10] sm:$0xff] }
   0xa   :  { %567 = vmatpush3.bf16.msra.mxu0 %v566_v10  ;;  %571 = vmatprep.subr.bf16.mxu1 %v634_v4  ;;  %v581_v37 = vpack.c.bf16 %v246_v35, %v245_v34  ;;  %v248_v38 = vld [vmem:[%s834_s3 + $0x18] sm:$0xff]  ;;  %v249_v40 = vld [vmem:[%s834_s3 + $0x20] sm:$0xff]  ;;  %v250_v41 = vld [vmem:[%s834_s3 + $0x28] sm:$0xff] }
   0xb   :  { %580 = vmatprep.subr.bf16.mxu0 %v634_v4  ;;  %v584_v39 = vpack.c.bf16 %v248_v38, %v247_v36  ;;  %v587_v42 = vpack.c.bf16 %v250_v41, %v249_v40  ;;  %v251_v43 = vld [vmem:[%s834_s3 + $0x30] sm:$0xff]  ;;  %v252_v44 = vld [vmem:[%s834_s3 + $0x38] sm:$0xff]  ;;  %v454_v46 = vld [vmem:[%s837_s6 + $0x1] ss:$0 sm:$0xff] }
   0xc   :  { %v590_v45 = vpack.c.bf16 %v252_v44, %v251_v43  ;;  %v456_v50 = vld [vmem:[%s836_s5 + $0x2] ss:$0 sm:$0xff]  ;;  %v348_v56 = vld [vmem:[%s835_s4 + $0x8] sm:$0xff]  ;;  %v349_v57 = vld [vmem:[%s835_s4 + $0x10] sm:$0xff] }
   0xd   :  { %573 = vmatpush3.bf16.msra.mxu1 %v572_v18  ;;  %v347_v55 = vld [vmem:[%s835_s4] sm:$0xff]  ;;  %v350_v59 = vld [vmem:[%s835_s4 + $0x18] sm:$0xff]  ;;  %v352_v62 = vld [vmem:[%s835_s4 + $0x28] sm:$0xff] }
   0xe   :  { %574 = vmatprep.subr.bf16.mxu1 %v634_v4  ;;  %v593_v58 = vpack.c.bf16 %v348_v56, %v347_v55  ;;  %v596_v60 = vpack.c.bf16 %v350_v59, %v349_v57  ;;  %v351_v61 = vld [vmem:[%s835_s4 + $0x20] sm:$0xff]  ;;  %v354_v1 = vld [vmem:[%s835_s4 + $0x38] sm:$0xff] }
   0xf   :  { %v599_v63 = vpack.c.bf16 %v352_v62, %v351_v61  ;;  %v457_v3 = vld [vmem:[%s837_s6 + $0x2] ss:$0 sm:$0xff]  ;;  %v459_v8 = vld [vmem:[%s836_s5 + $0x3] ss:$0 sm:$0xff]  ;;  %s610_s5 = scalar_lea.vmem %s443_s23, 128 }
  0x10   :  { %p611_p0 = scmp.ne.s32.totalorder %s443_s23, %s610_s5  ;;  %p616_p2 = scmp.lt.s32.totalorder %s610_s5, %s610_s5 }
  0x11   :  { %576 = vmatpush3.bf16.msra.mxu1 %v575_v21 }
  0x12   :  { %577 = vmatprep.subr.bf16.mxu1 %v634_v4  ;;  %p617_p3 = por %p616_p2, %p615_p1 }
  0x14   :  { %p618_p4 = pnand %p617_p3, %p611_p0 }
  0x15   :  { %579 = vmatpush3.bf16.msra.mxu1 %v578_v24 }
  0x16   :  { %592 = vmatprep.subr.bf16.mxu1 %v634_v4 }
  0x78   :  { %v39_v11 = vpop.permute.xlu0 %38 }
  0x79   :  { %v42_v12 = vsel %vm41_vm1, %v27_v0, %v39_v11  ;;  %v353_v0 = vld [vmem:[%s835_s4 + $0x30] sm:$0xff] }
  0x7a   :  { %503 = vmatmul.mubr.msk.f32.vlgmr.msra.gmra.mrb[0].mxu0 %vm53_vm2, %v42_v12  ;;  %v602_v2 = vpack.c.bf16 %v354_v1, %v353_v0 }
  0x7b   :  { %540 = vmatprep.mubr.msk.f32.mxu0 %vm635_vm0, %v636_v9  ;;  %582 = vmatpush3.bf16.msra.mxu0 %v581_v37 }
  0x7c   :  { %583 = vmatprep.subr.bf16.mxu0 %v634_v4 }
  0x7f   :  { %585 = vmatpush3.bf16.msra.mxu0 %v584_v39 }
  0x80   :  { %586 = vmatprep.subr.bf16.mxu0 %v634_v4 }
  0x83   :  { %588 = vmatpush3.bf16.msra.mxu0 %v587_v42 }
  0x84   :  { %589 = vmatprep.subr.bf16.mxu0 %v634_v4 }
  0x87   :  { %591 = vmatpush3.bf16.msra.mxu0 %v590_v45 }
 0x14d   :  { %v123_v26 = vpop.f32.mrb[0].mxu0 }
 0x14e   :  { %v124_v27 = vadd.f32 %v451_v25, %v123_v26  ;;  %v504_v28 = vpop.f32.mrb[1].mxu0 }
 0x150   :  { %v127_v30 = vmax.f32 %v124_v27, 0.0 }
 0x152   :  { %v136_v31 = vmul.f32 %v453_v29, %v127_v30 }
 0x154   :  { %138 = vrot.lane.b32.xlu0 %v136_v31, %s638_s2 }
 0x1c6   :  { %v139_v32 = vpop.permute.xlu0 %138 }
 0x1c7   :  { %v141_v33 = vsel %vm53_vm2, %v127_v30, %v139_v32 }
 0x1c8   :  { %522 = vmatmul.mubr.msk.f32.vlgmr.msra.gmra.mrb[0].mxu1 %vm156_vm3, %v141_v33 }
 0x1c9   :  { %559 = vmatprep.mubr.msk.f32.mxu1 %vm635_vm0, %v636_v9  ;;  %594 = vmatpush3.bf16.msra.mxu1 %v593_v58 }
 0x1ca   :  { %595 = vmatprep.subr.bf16.mxu1 %v634_v4 }
 0x1cd   :  { %597 = vmatpush3.bf16.msra.mxu1 %v596_v60 }
 0x1ce   :  { %598 = vmatprep.subr.bf16.mxu1 %v634_v4 }
 0x1d1   :  { %600 = vmatpush3.bf16.msra.mxu1 %v599_v63 }
 0x1d2   :  { %601 = vmatprep.subr.bf16.mxu1 %v634_v4  ;;  %v460_v4 = vld [vmem:[%s837_s6 + $0x3] ss:$0 sm:$0xff] }
 0x1d5   :  { %603 = vmatpush3.bf16.msra.mxu1 %v602_v2 }
 0x29b   :  { %v226_v47 = vpop.f32.mrb[0].mxu1 }
 0x29c   :  { %v227_v48 = vadd.f32 %v454_v46, %v226_v47  ;;  %v523_v49 = vpop.f32.mrb[1].mxu1 }
 0x29e   :  { %v230_v51 = vmax.f32 %v227_v48, 0.0 }
 0x2a0   :  { %v239_v52 = vmul.f32 %v456_v50, %v230_v51 }
 0x2a2   :  { %241 = vrot.lane.b32.xlu1 %v239_v52, %s638_s2 }
 0x314   :  { %v242_v53 = vpop.permute.xlu1 %241 }
 0x315   :  { %v244_v54 = vsel %vm53_vm2, %v230_v51, %v242_v53 }
 0x316   :  { %541 = vmatmul.mubr.msk.f32.vlgmr.msra.gmra.mrb[2].mxu0 %vm156_vm3, %v244_v54 }
 0x3e9   :  { %v328_v5 = vpop.f32.mrb[2].mxu0 }
 0x3ea   :  { %v329_v6 = vadd.f32 %v457_v3, %v328_v5  ;;  %v542_v7 = vpop.f32.mrb[3].mxu0 }
 0x3ec   :  { %v332_v9 = vmax.f32 %v329_v6, 0.0 }
 0x3ee   :  { %v341_v10 = vmul.f32 %v459_v8, %v332_v9 }
 0x3f0   :  { %343 = vrot.lane.b32.xlu1 %v341_v10, %s638_s2 }
 0x462   :  { %v344_v11 = vpop.permute.xlu1 %343 }
 0x463   :  { %v346_v12 = vsel %vm53_vm2, %v332_v9, %v344_v11 }
 0x464   :  { %560 = vmatmul.mubr.msk.f32.vlgmr.msra.gmra.mrb[2].mxu1 %vm156_vm3, %v346_v12 }
 0x537   :  { %v430_v13 = vpop.f32.mrb[2].mxu1 }
 0x538   :  { %v431_v14 = vadd.f32 %v460_v4, %v430_v13  ;;  %v561_v15 = vpop.f32.mrb[3].mxu1 }
 0x53a   :  { %435 = vst.msk [vmem:[#allocation2] sm:$0xff] %vm434_vm4, %v431_v14 }
 0x53b   :  { %621 = shalt.err (!%p618_p4)
}
 0x53c   :  { %s622_s25 = scalar_lea.hbm %s838_s7, 128 }
 0x53d   :  { %p623_p5 = scmp.ne.s32.totalorder %s838_s7, %s622_s25  ;;  %p626_p6 = scmp.lt.u32.totalorder %s622_s25, %s838_s7 }
 0x53f   :  { %p628_p7 = pnand %p626_p6, %p623_p5 }
 0x541   :  { %631 = shalt.err (!%p628_p7)
}
 0x542   :  { %445 = dma.vmem_to_hbm [thread:$0]  %s443_s23, 128, %s838_s7, [#allocation3]  }
 0x543   :  { %632 = dma.done.wait [#allocation3], 128  }
 0x544   :  { %633 = vsyncadd [#allocation3], 4294967168 }
 0x545   :  { %449 = vsyncpa [#allocation3], 1 }

</bundles_post_ra>
